<compile_context>
chip_gen: v7x
topology: tpu7x:2x2x1
jax: 0.10.0
libtpu: 0.0.40
codegen_flags: <defaults>
</compile_context>

<pallas_src>
import jax
import jax.numpy as jnp
from jax.experimental import pallas as pl
from jax.experimental.pallas import tpu as pltpu

LANE = 128   # lane-dense padded width (hidden + feature dims)
SUB = 16     # sublane padding for node counts (covers bf16 & f32 layouts)


def _round_up(x, m):
    return -(-x // m) * m


def _pad2(a, rows, cols):
    return jnp.pad(a, ((0, rows - a.shape[0]), (0, cols - a.shape[1])))


def _vmem_limit_bytes():
    # ~100 MiB budget on 128 MiB parts (v5e/v6e), ~56 MiB on 64 MiB parts (v7x).
    try:
        cap = int(pltpu.get_tpu_info().vmem_capacity_bytes)
    except Exception:
        cap = 64 << 20
    return int(min(cap - (8 << 20), 100 << 20))


# ----------------------------------------------------------------------------
# Fused kernel: conv1 + conv2 over both edge types, intermediates in VMEM.
# ----------------------------------------------------------------------------
def _fused_gnn_kernel(
    # graph: adjacencies (bf16, exact counts), inverse degrees (f32), features (bf16)
    adj_ui_ref, adj_iu_ref, inv_ui_ref, inv_iu_ref, xu_ref, xi_ref,
    # stacked weights [w_l; w_r] (bf16) + bias (f32) per (layer, edge type)
    w1_ui_ref, b1_ui_ref, w1_iu_ref, b1_iu_ref,
    w2_ui_ref, b2_ui_ref, w2_iu_ref, b2_iu_ref,
    # outputs (f32, lane-padded)
    ou_ref, oi_ref,
    # VMEM scratch for layer-1 activations (bf16, lane-padded)
    zu_scr, zi_scr,
):
    def sage(adj, inv_deg, x_src, x_dst, w_cat, b):
        # mean aggregation: bf16 MXU matmul with f32 accumulate, f32 1/deg scale.
        agg = jnp.dot(adj, x_src, preferred_element_type=jnp.float32) * inv_deg
        # fused lin_l(agg) + lin_r(x_dst): single matmul with stacked weights.
        h = jnp.concatenate([agg.astype(jnp.bfloat16), x_dst], axis=-1)
        out = jnp.dot(h, w_cat, preferred_element_type=jnp.float32) + b
        # F.normalize(out, p=2, dim=-1), eps=1e-12 -> rsqrt on the EUP.
        sumsq = jnp.sum(out * out, axis=-1, keepdims=True)
        inv = jax.lax.rsqrt(jnp.maximum(sumsq, 1e-24))
        # .relu()
        return jnp.maximum(out * inv, 0.0)

    adj_ui = adj_ui_ref[...]          # [N_item, N_user] bf16 (counts)
    adj_iu = adj_iu_ref[...]          # [N_user, N_item] bf16 (counts)
    inv_ui = inv_ui_ref[...]          # [N_item, 1] f32
    inv_iu = inv_iu_ref[...]          # [N_user, 1] f32
    x_user = xu_ref[...]              # [N_user, Fp_user] bf16
    x_item = xi_ref[...]              # [N_item, Fp_item] bf16

    # ---- layer 1 (stored in bf16 scratch; never leaves VMEM) ----
    zi_scr[...] = sage(adj_ui, inv_ui, x_user, x_item,
                       w1_ui_ref[...], b1_ui_ref[...]).astype(jnp.bfloat16)
    zu_scr[...] = sage(adj_iu, inv_iu, x_item, x_user,
                       w1_iu_ref[...], b1_iu_ref[...]).astype(jnp.bfloat16)

    # ---- layer 2 ----
    zu = zu_scr[...]
    zi = zi_scr[...]
    oi_ref[...] = sage(adj_ui, inv_ui, zu, zi, w2_ui_ref[...], b2_ui_ref[...])
    ou_ref[...] = sage(adj_iu, inv_iu, zi, zu, w2_iu_ref[...], b2_iu_ref[...])


# ----------------------------------------------------------------------------
# One-time graph preparation (pad + cast), outside the forward.
# ----------------------------------------------------------------------------
def count_adjacency(edge_index, n_src, n_dst):
    """edge_index: [2, E] (row 0 = src, row 1 = dst) -> (counts [N_dst, N_src], 1/deg [N_dst, 1])."""
    src, dst = edge_index[0], edge_index[1]
    adj = jnp.zeros((n_dst, n_src), jnp.float32).at[dst, src].add(1.0)
    deg = jnp.sum(adj, axis=1, keepdims=True)
    inv_deg = jnp.where(deg > 0, 1.0 / jnp.maximum(deg, 1.0), 0.0)
    return adj, inv_deg


def prepare_graph(x_dict, adj_ui, inv_ui, adj_iu, inv_iu):
    n_user, f_user = x_dict["user"].shape
    n_item, f_item = x_dict["item"].shape
    nup, nip = _round_up(n_user, SUB), _round_up(n_item, SUB)
    fpu, fpi = _round_up(f_user, LANE), _round_up(f_item, LANE)
    return {
        "adj_ui": _pad2(adj_ui, nip, nup).astype(jnp.bfloat16),
        "adj_iu": _pad2(adj_iu, nup, nip).astype(jnp.bfloat16),
        "inv_ui": _pad2(inv_ui, nip, 1).astype(jnp.float32),
        "inv_iu": _pad2(inv_iu, nup, 1).astype(jnp.float32),
        "xu": _pad2(x_dict["user"], nup, fpu).astype(jnp.bfloat16),
        "xi": _pad2(x_dict["item"], nip, fpi).astype(jnp.bfloat16),
        "dims": (n_user, n_item, nup, nip, fpu, fpi),
    }


# ----------------------------------------------------------------------------
# One-time parameter preparation (pad, cast, stack [w_l; w_r]), outside forward.
# ----------------------------------------------------------------------------
def prepare_params(params, f_user, f_item, hidden):
    hp = _round_up(hidden, LANE)
    fpu, fpi = _round_up(f_user, LANE), _round_up(f_item, LANE)

    def prep(p, in_l, in_r):
        w_l = _pad2(p["w_l"], in_l, hp)
        w_r = _pad2(p["w_r"], in_r, hp)
        w_cat = jnp.concatenate([w_l, w_r], axis=0).astype(jnp.bfloat16)
        b = _pad2(p["b_l"], 1, hp).astype(jnp.float32)
        return w_cat, b

    out = {"hp": hp}
    out["w1_ui"], out["b1_ui"] = prep(params["conv1"]["user__rates__item"], fpu, fpi)
    out["w1_iu"], out["b1_iu"] = prep(params["conv1"]["item__rev_rates__user"], fpi, fpu)
    out["w2_ui"], out["b2_ui"] = prep(params["conv2"]["user__rates__item"], hp, hp)
    out["w2_iu"], out["b2_iu"] = prep(params["conv2"]["item__rev_rates__user"], hp, hp)
    return out


# ----------------------------------------------------------------------------
# Forward: single pallas_call on the pre-padded operands, slice padding off.
# ----------------------------------------------------------------------------
def embeddings_model_forward(graph, prepped, hidden):
    n_user, n_item, nup, nip, _, _ = graph["dims"]
    hp = prepped["hp"]

    args = [
        graph["adj_ui"], graph["adj_iu"], graph["inv_ui"], graph["inv_iu"],
        graph["xu"], graph["xi"],
        prepped["w1_ui"], prepped["b1_ui"], prepped["w1_iu"], prepped["b1_iu"],
        prepped["w2_ui"], prepped["b2_ui"], prepped["w2_iu"], prepped["b2_iu"],
    ]

    full = lambda a: pl.BlockSpec(a.shape, lambda: (0,) * a.ndim)

    out_user, out_item = pl.pallas_call(
        _fused_gnn_kernel,
        out_shape=(
            jax.ShapeDtypeStruct((nup, hp), jnp.float32),
            jax.ShapeDtypeStruct((nip, hp), jnp.float32),
        ),
        in_specs=[full(a) for a in args],
        out_specs=(
            pl.BlockSpec((nup, hp), lambda: (0, 0)),
            pl.BlockSpec((nip, hp), lambda: (0, 0)),
        ),
        scratch_shapes=[
            pltpu.VMEM((nup, hp), jnp.bfloat16),
            pltpu.VMEM((nip, hp), jnp.bfloat16),
        ],
        compiler_params=pltpu.CompilerParams(
            vmem_limit_bytes=_vmem_limit_bytes()),
    )(*args)

    return {"user": out_user[:n_user, :hidden], "item": out_item[:n_item, :hidden]}


# ----------------------------------------------------------------------------
# Parameter init (per-edge-type SAGEConv lin_l weight+bias, lin_r weight),
# mirroring what to_hetero materializes.  Stored as [F_in, H] (pre-transposed).
# ----------------------------------------------------------------------------
def init_params(key, f_user, f_item, hidden):
    def lin(k, fin, fout):
        scale = 1.0 / jnp.sqrt(jnp.float32(fin))
        return jax.random.uniform(k, (fin, fout), jnp.float32, -scale, scale)

    keys = jax.random.split(key, 8)
    return {
        "conv1": {
            "user__rates__item": {
                "w_l": lin(keys[0], f_user, hidden),
                "b_l": jnp.zeros((1, hidden), jnp.float32),
                "w_r": lin(keys[1], f_item, hidden),
            },
            "item__rev_rates__user": {
                "w_l": lin(keys[2], f_item, hidden),
                "b_l": jnp.zeros((1, hidden), jnp.float32),
                "w_r": lin(keys[3], f_user, hidden),
            },
        },
        "conv2": {
            "user__rates__item": {
                "w_l": lin(keys[4], hidden, hidden),
                "b_l": jnp.zeros((1, hidden), jnp.float32),
                "w_r": lin(keys[5], hidden, hidden),
            },
            "item__rev_rates__user": {
                "w_l": lin(keys[6], hidden, hidden),
                "b_l": jnp.zeros((1, hidden), jnp.float32),
                "w_r": lin(keys[7], hidden, hidden),
            },
        },
    }


# ----------------------------------------------------------------------------
# Pure-JAX f32 reference (for correctness check against the bf16 kernel).
# ----------------------------------------------------------------------------
def _ref_sage(adj, inv_deg, xs, xd, wl, bl, wr):
    agg = (adj @ xs) * inv_deg
    out = agg @ wl + bl + xd @ wr
    n = jnp.sqrt(jnp.sum(out * out, axis=-1, keepdims=True))
    return jnp.maximum(out / jnp.maximum(n, 1e-12), 0.0)


def _ref_forward(x_dict, adj_ui, inv_ui, adj_iu, inv_iu, params):
    z = dict(x_dict)
    for layer in ("conv1", "conv2"):
        p = params[layer]["user__rates__item"]
        zi = _ref_sage(adj_ui, inv_ui, z["user"], z["item"],
                       p["w_l"], p["b_l"], p["w_r"])
        p = params[layer]["item__rev_rates__user"]
        zu = _ref_sage(adj_iu, inv_iu, z["item"], z["user"],
                       p["w_l"], p["b_l"], p["w_r"])
        z = {"user": zu, "item": zi}
    return z


if __name__ == "__main__":
    key = jax.random.PRNGKey(0)
    k_xu, k_xi, k_e, k_p = jax.random.split(key, 4)

    # Small hetero graph: 16 users x 32 feats, 16 items x 32 feats, 40 edges.
    N_USER, N_ITEM = 16, 16
    F_USER, F_ITEM = 32, 32
    HIDDEN = 32
    N_EDGES = 40

    x_dict = {
        "user": jax.random.normal(k_xu, (N_USER, F_USER), jnp.float32),
        "item": jax.random.normal(k_xi, (N_ITEM, F_ITEM), jnp.float32),
    }

    src = jax.random.randint(jax.random.fold_in(k_e, 0), (N_EDGES,), 0, N_USER)
    dst = jax.random.randint(jax.random.fold_in(k_e, 1), (N_EDGES,), 0, N_ITEM)
    edge_ui = jnp.stack([src, dst], axis=0)   # user -> item
    edge_iu = jnp.stack([dst, src], axis=0)   # item -> user (reversed)

    # exact 0/1(count) adjacencies + f32 inverse degrees
    adj_ui, inv_ui = count_adjacency(edge_ui, N_USER, N_ITEM)   # [N_item, N_user]
    adj_iu, inv_iu = count_adjacency(edge_iu, N_ITEM, N_USER)   # [N_user, N_item]

    params = init_params(k_p, F_USER, F_ITEM, HIDDEN)

    # One-time preparation (padding / casting / weight stacking) outside forward.
    graph = prepare_graph(x_dict, adj_ui, inv_ui, adj_iu, inv_iu)
    prepped = prepare_params(params, F_USER, F_ITEM, HIDDEN)

    z_dict = embeddings_model_forward(graph, prepped, HIDDEN)
    jax.block_until_ready(z_dict)

    assert z_dict["user"].shape == (N_USER, HIDDEN)
    assert z_dict["item"].shape == (N_ITEM, HIDDEN)

    # Validate bf16-operand kernel against the f32 reference (loose tolerance).
    ref = _ref_forward(x_dict, adj_ui, inv_ui, adj_iu, inv_iu, params)
    for k in ("user", "item"):
        err = float(jnp.max(jnp.abs(z_dict[k] - ref[k])))
        assert err < 5e-2, f"{k} max abs err {err}"

    print("KERNEL_OK")
</pallas_src>

<mosaic_0001>
module attributes {stable_mosaic.version = 11 : i64} {
  func.func @_fused_gnn_kernel(%arg0: memref<16x16xbf16, #tpu.memory_space<vmem>>, %arg1: memref<16x16xbf16, #tpu.memory_space<vmem>>, %arg2: memref<16x1xf32, #tpu.memory_space<vmem>>, %arg3: memref<16x1xf32, #tpu.memory_space<vmem>>, %arg4: memref<16x128xbf16, #tpu.memory_space<vmem>>, %arg5: memref<16x128xbf16, #tpu.memory_space<vmem>>, %arg6: memref<256x128xbf16, #tpu.memory_space<vmem>>, %arg7: memref<1x128xf32, #tpu.memory_space<vmem>>, %arg8: memref<256x128xbf16, #tpu.memory_space<vmem>>, %arg9: memref<1x128xf32, #tpu.memory_space<vmem>>, %arg10: memref<256x128xbf16, #tpu.memory_space<vmem>>, %arg11: memref<1x128xf32, #tpu.memory_space<vmem>>, %arg12: memref<256x128xbf16, #tpu.memory_space<vmem>>, %arg13: memref<1x128xf32, #tpu.memory_space<vmem>>, %arg14: memref<16x128xf32, #tpu.memory_space<vmem>>, %arg15: memref<16x128xf32, #tpu.memory_space<vmem>>, %arg16: memref<16x128xbf16, #tpu.memory_space<vmem>>, %arg17: memref<16x128xbf16, #tpu.memory_space<vmem>>) attributes {dimension_semantics = [], scalar_prefetch = 0 : i64, scratch_operands = 2 : i64, tpu.core_type = #tpu.core_type<tc>} {
    %c0 = arith.constant 0 : index
    %c0_0 = arith.constant 0 : index
    %0 = vector.load %arg0[%c0, %c0_0] : memref<16x16xbf16, #tpu.memory_space<vmem>>, vector<16x16xbf16>
    %c0_1 = arith.constant 0 : index
    %c0_2 = arith.constant 0 : index
    %1 = vector.load %arg1[%c0_1, %c0_2] : memref<16x16xbf16, #tpu.memory_space<vmem>>, vector<16x16xbf16>
    %c0_3 = arith.constant 0 : index
    %c0_4 = arith.constant 0 : index
    %2 = vector.load %arg2[%c0_3, %c0_4] : memref<16x1xf32, #tpu.memory_space<vmem>>, vector<16x1xf32>
    %c0_5 = arith.constant 0 : index
    %c0_6 = arith.constant 0 : index
    %3 = vector.load %arg3[%c0_5, %c0_6] : memref<16x1xf32, #tpu.memory_space<vmem>>, vector<16x1xf32>
    %c0_7 = arith.constant 0 : index
    %c0_8 = arith.constant 0 : index
    %4 = vector.load %arg4[%c0_7, %c0_8] : memref<16x128xbf16, #tpu.memory_space<vmem>>, vector<16x128xbf16>
    %c0_9 = arith.constant 0 : index
    %c0_10 = arith.constant 0 : index
    %5 = vector.load %arg5[%c0_9, %c0_10] : memref<16x128xbf16, #tpu.memory_space<vmem>>, vector<16x128xbf16>
    %c0_11 = arith.constant 0 : index
    %c0_12 = arith.constant 0 : index
    %6 = vector.load %arg6[%c0_11, %c0_12] : memref<256x128xbf16, #tpu.memory_space<vmem>>, vector<256x128xbf16>
    %c0_13 = arith.constant 0 : index
    %c0_14 = arith.constant 0 : index
    %7 = vector.load %arg7[%c0_13, %c0_14] : memref<1x128xf32, #tpu.memory_space<vmem>>, vector<1x128xf32>
    %cst = arith.constant dense<0.000000e+00> : vector<16x128xf32>
    %8 = tpu.matmul %0, %4, %cst {dimension_numbers = #tpu.dot_dimension_numbers<[1], [0], [0], [1], [0, 0, 1, 1], [], []>} : vector<16x16xbf16>, vector<16x128xbf16>, vector<16x128xf32> -> vector<16x128xf32>
    %9 = vector.broadcast %2 : vector<16x1xf32> to vector<16x128xf32>
    %10 = arith.mulf %8, %9 : vector<16x128xf32>
    %11 = arith.truncf %10 : vector<16x128xf32> to vector<16x128xbf16>
    %12 = tpu.concatenate %11, %5 in 1 : vector<16x128xbf16>, vector<16x128xbf16> -> vector<16x256xbf16>
    %cst_15 = arith.constant dense<0.000000e+00> : vector<16x128xf32>
    %13 = tpu.matmul %12, %6, %cst_15 {dimension_numbers = #tpu.dot_dimension_numbers<[1], [0], [0], [1], [0, 0, 1, 1], [], []>} : vector<16x256xbf16>, vector<256x128xbf16>, vector<16x128xf32> -> vector<16x128xf32>
    %14 = vector.broadcast %7 : vector<1x128xf32> to vector<16x128xf32>
    %15 = arith.addf %13, %14 : vector<16x128xf32>
    %16 = arith.mulf %15, %15 : vector<16x128xf32>
    %cst_16 = arith.constant dense<0.000000e+00> : vector<16xf32>
    %17 = vector.multi_reduction <add>, %16, %cst_16 [1] : vector<16x128xf32> to vector<16xf32>
    %18 = vector.shape_cast %17 : vector<16xf32> to vector<16x1xf32>
    %cst_17 = arith.constant 1.000000e-24 : f32
    %19 = vector.broadcast %cst_17 : f32 to vector<16x1xf32>
    %20 = arith.maximumf %18, %19 : vector<16x1xf32>
    %21 = math.rsqrt %20 : vector<16x1xf32>
    %22 = vector.broadcast %21 : vector<16x1xf32> to vector<16x128xf32>
    %23 = arith.mulf %15, %22 : vector<16x128xf32>
    %cst_18 = arith.constant 0.000000e+00 : f32
    %24 = vector.broadcast %cst_18 : f32 to vector<16x128xf32>
    %25 = arith.maximumf %23, %24 : vector<16x128xf32>
    %26 = arith.truncf %25 : vector<16x128xf32> to vector<16x128xbf16>
    %c0_19 = arith.constant 0 : index
    %c0_20 = arith.constant 0 : index
    %27 = vector.load %arg17[%c0_19, %c0_20] : memref<16x128xbf16, #tpu.memory_space<vmem>>, vector<16x128xbf16>
    tpu.vector_store %arg17[%c0_19, %c0_20], %26 {strides = array<i32>} : memref<16x128xbf16, #tpu.memory_space<vmem>>, vector<16x128xbf16>,
    %c0_21 = arith.constant 0 : index
    %c0_22 = arith.constant 0 : index
    %28 = vector.load %arg8[%c0_21, %c0_22] : memref<256x128xbf16, #tpu.memory_space<vmem>>, vector<256x128xbf16>
    %c0_23 = arith.constant 0 : index
    %c0_24 = arith.constant 0 : index
    %29 = vector.load %arg9[%c0_23, %c0_24] : memref<1x128xf32, #tpu.memory_space<vmem>>, vector<1x128xf32>
    %cst_25 = arith.constant dense<0.000000e+00> : vector<16x128xf32>
    %30 = tpu.matmul %1, %5, %cst_25 {dimension_numbers = #tpu.dot_dimension_numbers<[1], [0], [0], [1], [0, 0, 1, 1], [], []>} : vector<16x16xbf16>, vector<16x128xbf16>, vector<16x128xf32> -> vector<16x128xf32>
    %31 = vector.broadcast %3 : vector<16x1xf32> to vector<16x128xf32>
    %32 = arith.mulf %30, %31 : vector<16x128xf32>
    %33 = arith.truncf %32 : vector<16x128xf32> to vector<16x128xbf16>
    %34 = tpu.concatenate %33, %4 in 1 : vector<16x128xbf16>, vector<16x128xbf16> -> vector<16x256xbf16>
    %cst_26 = arith.constant dense<0.000000e+00> : vector<16x128xf32>
    %35 = tpu.matmul %34, %28, %cst_26 {dimension_numbers = #tpu.dot_dimension_numbers<[1], [0], [0], [1], [0, 0, 1, 1], [], []>} : vector<16x256xbf16>, vector<256x128xbf16>, vector<16x128xf32> -> vector<16x128xf32>
    %36 = vector.broadcast %29 : vector<1x128xf32> to vector<16x128xf32>
    %37 = arith.addf %35, %36 : vector<16x128xf32>
    %38 = arith.mulf %37, %37 : vector<16x128xf32>
    %cst_27 = arith.constant dense<0.000000e+00> : vector<16xf32>
    %39 = vector.multi_reduction <add>, %38, %cst_27 [1] : vector<16x128xf32> to vector<16xf32>
    %40 = vector.shape_cast %39 : vector<16xf32> to vector<16x1xf32>
    %cst_28 = arith.constant 1.000000e-24 : f32
    %41 = vector.broadcast %cst_28 : f32 to vector<16x1xf32>
    %42 = arith.maximumf %40, %41 : vector<16x1xf32>
    %43 = math.rsqrt %42 : vector<16x1xf32>
    %44 = vector.broadcast %43 : vector<16x1xf32> to vector<16x128xf32>
    %45 = arith.mulf %37, %44 : vector<16x128xf32>
    %cst_29 = arith.constant 0.000000e+00 : f32
    %46 = vector.broadcast %cst_29 : f32 to vector<16x128xf32>
    %47 = arith.maximumf %45, %46 : vector<16x128xf32>
    %48 = arith.truncf %47 : vector<16x128xf32> to vector<16x128xbf16>
    %c0_30 = arith.constant 0 : index
    %c0_31 = arith.constant 0 : index
    %49 = vector.load %arg16[%c0_30, %c0_31] : memref<16x128xbf16, #tpu.memory_space<vmem>>, vector<16x128xbf16>
    tpu.vector_store %arg16[%c0_30, %c0_31], %48 {strides = array<i32>} : memref<16x128xbf16, #tpu.memory_space<vmem>>, vector<16x128xbf16>,
    %c0_32 = arith.constant 0 : index
    %c0_33 = arith.constant 0 : index
    %50 = vector.load %arg16[%c0_32, %c0_33] : memref<16x128xbf16, #tpu.memory_space<vmem>>, vector<16x128xbf16>
    %c0_34 = arith.constant 0 : index
    %c0_35 = arith.constant 0 : index
    %51 = vector.load %arg17[%c0_34, %c0_35] : memref<16x128xbf16, #tpu.memory_space<vmem>>, vector<16x128xbf16>
    %c0_36 = arith.constant 0 : index
    %c0_37 = arith.constant 0 : index
    %52 = vector.load %arg10[%c0_36, %c0_37] : memref<256x128xbf16, #tpu.memory_space<vmem>>, vector<256x128xbf16>
    %c0_38 = arith.constant 0 : index
    %c0_39 = arith.constant 0 : index
    %53 = vector.load %arg11[%c0_38, %c0_39] : memref<1x128xf32, #tpu.memory_space<vmem>>, vector<1x128xf32>
    %cst_40 = arith.constant dense<0.000000e+00> : vector<16x128xf32>
    %54 = tpu.matmul %0, %50, %cst_40 {dimension_numbers = #tpu.dot_dimension_numbers<[1], [0], [0], [1], [0, 0, 1, 1], [], []>} : vector<16x16xbf16>, vector<16x128xbf16>, vector<16x128xf32> -> vector<16x128xf32>
    %55 = vector.broadcast %2 : vector<16x1xf32> to vector<16x128xf32>
    %56 = arith.mulf %54, %55 : vector<16x128xf32>
    %57 = arith.truncf %56 : vector<16x128xf32> to vector<16x128xbf16>
    %58 = tpu.concatenate %57, %51 in 1 : vector<16x128xbf16>, vector<16x128xbf16> -> vector<16x256xbf16>
    %cst_41 = arith.constant dense<0.000000e+00> : vector<16x128xf32>
    %59 = tpu.matmul %58, %52, %cst_41 {dimension_numbers = #tpu.dot_dimension_numbers<[1], [0], [0], [1], [0, 0, 1, 1], [], []>} : vector<16x256xbf16>, vector<256x128xbf16>, vector<16x128xf32> -> vector<16x128xf32>
    %60 = vector.broadcast %53 : vector<1x128xf32> to vector<16x128xf32>
    %61 = arith.addf %59, %60 : vector<16x128xf32>
    %62 = arith.mulf %61, %61 : vector<16x128xf32>
    %cst_42 = arith.constant dense<0.000000e+00> : vector<16xf32>
    %63 = vector.multi_reduction <add>, %62, %cst_42 [1] : vector<16x128xf32> to vector<16xf32>
    %64 = vector.shape_cast %63 : vector<16xf32> to vector<16x1xf32>
    %cst_43 = arith.constant 1.000000e-24 : f32
    %65 = vector.broadcast %cst_43 : f32 to vector<16x1xf32>
    %66 = arith.maximumf %64, %65 : vector<16x1xf32>
    %67 = math.rsqrt %66 : vector<16x1xf32>
    %68 = vector.broadcast %67 : vector<16x1xf32> to vector<16x128xf32>
    %69 = arith.mulf %61, %68 : vector<16x128xf32>
    %cst_44 = arith.constant 0.000000e+00 : f32
    %70 = vector.broadcast %cst_44 : f32 to vector<16x128xf32>
    %71 = arith.maximumf %69, %70 : vector<16x128xf32>
    %c0_45 = arith.constant 0 : index
    %c0_46 = arith.constant 0 : index
    %72 = vector.load %arg15[%c0_45, %c0_46] : memref<16x128xf32, #tpu.memory_space<vmem>>, vector<16x128xf32>
    tpu.vector_store %arg15[%c0_45, %c0_46], %71 {strides = array<i32>} : memref<16x128xf32, #tpu.memory_space<vmem>>, vector<16x128xf32>,
    %c0_47 = arith.constant 0 : index
    %c0_48 = arith.constant 0 : index
    %73 = vector.load %arg12[%c0_47, %c0_48] : memref<256x128xbf16, #tpu.memory_space<vmem>>, vector<256x128xbf16>
    %c0_49 = arith.constant 0 : index
    %c0_50 = arith.constant 0 : index
    %74 = vector.load %arg13[%c0_49, %c0_50] : memref<1x128xf32, #tpu.memory_space<vmem>>, vector<1x128xf32>
    %cst_51 = arith.constant dense<0.000000e+00> : vector<16x128xf32>
    %75 = tpu.matmul %1, %51, %cst_51 {dimension_numbers = #tpu.dot_dimension_numbers<[1], [0], [0], [1], [0, 0, 1, 1], [], []>} : vector<16x16xbf16>, vector<16x128xbf16>, vector<16x128xf32> -> vector<16x128xf32>
    %76 = vector.broadcast %3 : vector<16x1xf32> to vector<16x128xf32>
    %77 = arith.mulf %75, %76 : vector<16x128xf32>
    %78 = arith.truncf %77 : vector<16x128xf32> to vector<16x128xbf16>
    %79 = tpu.concatenate %78, %50 in 1 : vector<16x128xbf16>, vector<16x128xbf16> -> vector<16x256xbf16>
    %cst_52 = arith.constant dense<0.000000e+00> : vector<16x128xf32>
    %80 = tpu.matmul %79, %73, %cst_52 {dimension_numbers = #tpu.dot_dimension_numbers<[1], [0], [0], [1], [0, 0, 1, 1], [], []>} : vector<16x256xbf16>, vector<256x128xbf16>, vector<16x128xf32> -> vector<16x128xf32>
    %81 = vector.broadcast %74 : vector<1x128xf32> to vector<16x128xf32>
    %82 = arith.addf %80, %81 : vector<16x128xf32>
    %83 = arith.mulf %82, %82 : vector<16x128xf32>
    %cst_53 = arith.constant dense<0.000000e+00> : vector<16xf32>
    %84 = vector.multi_reduction <add>, %83, %cst_53 [1] : vector<16x128xf32> to vector<16xf32>
    %85 = vector.shape_cast %84 : vector<16xf32> to vector<16x1xf32>
    %cst_54 = arith.constant 1.000000e-24 : f32
    %86 = vector.broadcast %cst_54 : f32 to vector<16x1xf32>
    %87 = arith.maximumf %85, %86 : vector<16x1xf32>
    %88 = math.rsqrt %87 : vector<16x1xf32>
    %89 = vector.broadcast %88 : vector<16x1xf32> to vector<16x128xf32>
    %90 = arith.mulf %82, %89 : vector<16x128xf32>
    %cst_55 = arith.constant 0.000000e+00 : f32
    %91 = vector.broadcast %cst_55 : f32 to vector<16x128xf32>
    %92 = arith.maximumf %90, %91 : vector<16x128xf32>
    %c0_56 = arith.constant 0 : index
    %c0_57 = arith.constant 0 : index
    %93 = vector.load %arg14[%c0_56, %c0_57] : memref<16x128xf32, #tpu.memory_space<vmem>>, vector<16x128xf32>
    tpu.vector_store %arg14[%c0_56, %c0_57], %92 {strides = array<i32>} : memref<16x128xf32, #tpu.memory_space<vmem>>, vector<16x128xf32>,
    return
  }
}

</mosaic_0001>

<bundles_post_ra>
// kernel: tpu_custom_call.1
= control target key start
LH: loop header
LB: loop body
LE: loop exit
PB: predicated region body
PF: predicated region fallthrough
CT: control target
= control target key end

     0   :  { %21 = vsyncpa [#allocation5], 0  ;;  %s1853_s0 = inlined_call_operand.vmem [shape: bf16[16,16], index: 0, kind: input, shape index: {}]   ;;  %s1854_s1 = inlined_call_operand.vmem [shape: bf16[16,16], index: 1, kind: input, shape index: {}]   ;;  %s1855_s2 = inlined_call_operand.vmem [shape: f32[16,1], index: 2, kind: input, shape index: {}]   ;;  %s1856_s3 = inlined_call_operand.vmem [shape: f32[16,1], index: 3, kind: input, shape index: {}]   ;;  %s1857_s4 = inlined_call_operand.vmem [shape: bf16[16,128], index: 4, kind: input, shape index: {}]   ;;  %s1858_s5 = inlined_call_operand.vmem [shape: bf16[16,128], index: 5, kind: input, shape index: {}]   ;;  %s1859_s6 = inlined_call_operand.hbm [shape: bf16[256,128], index: 6, kind: input, shape index: {}]   ;;  %s1860_s7 = inlined_call_operand.vmem [shape: f32[1,128], index: 7, kind: input, shape index: {}]   ;;  %s1861_s8 = inlined_call_operand.hbm [shape: bf16[256,128], index: 8, kind: input, shape index: {}]   ;;  %s1862_s9 = inlined_call_operand.vmem [shape: f32[1,128], index: 9, kind: input, shape index: {}]   ;;  %s1863_s10 = inlined_call_operand.hbm [shape: bf16[256,128], index: 10, kind: input, shape index: {}]   ;;  %s1864_s11 = inlined_call_operand.vmem [shape: f32[1,128], index: 11, kind: input, shape index: {}]   ;;  %s1865_s12 = inlined_call_operand.hbm [shape: bf16[256,128], index: 12, kind: input, shape index: {}]   ;;  %s1866_s13 = inlined_call_operand.vmem [shape: f32[1,128], index: 13, kind: input, shape index: {}]   ;;  %s1867_s14 = inlined_call_operand.hbm [shape: f32[16,128], index: 14, kind: output, shape index: {0}]   ;;  %s1868_s15 = inlined_call_operand.hbm [shape: f32[16,128], index: 15, kind: output, shape index: {1}]  }
   0x1   :  { %22 = vsyncpa [#allocation8], 0 }
   0x2   :  { %23 = vsyncpa [#allocation11], 0 }
   0x3   :  { %24 = vsyncpa [#allocation6], 0 }
   0x4   :  { %25 = vsyncpa [#allocation14], 0  ;;  %s1586_s18 = smov [#allocation7]   ;;  %s1587_s20 = smov [#allocation4]  }
   0x5   :  { %s57_s19 = sshll.u32 %s1586_s18, 4  ;;  %s43_s21 = sshll.u32 %s1587_s20, 4  ;;  %s58_s19 = int_to_ptr.vmem [resolvable:$true] %s57_s19  ;;  %s1679_s21 = int_to_ptr.vmem [resolvable:$true] %s43_s21 }
   0x6   :  { %s1444_s24 = scalar_lea.hbm %s1861_s8, 2048 }
   0x7   :  { %p1445_p0 = scmp.ne.s32.totalorder %s1861_s8, %s1444_s24  ;;  %p1448_p1 = scmp.lt.u32.totalorder %s1444_s24, %s1861_s8 }
   0x9   :  { %p1450_p2 = pnand %p1448_p1, %p1445_p0 }
   0xb   :  { %1453 = shalt.err (!%p1450_p2)
}
   0xc   :  { %s1454_s29 = scalar_lea.vmem %s58_s19, 2048  ;;  %p1459_p4 = scmp.lt.s32.totalorder %s58_s19, %s58_s19 }
   0xd   :  { %p1455_p3 = scmp.ne.s32.totalorder %s58_s19, %s1454_s29  ;;  %p1460_p5 = scmp.lt.s32.totalorder %s1454_s29, %s1454_s29 }
   0xf   :  { %p1461_p6 = por %p1460_p5, %p1459_p4 }
  0x11   :  { %p1462_p7 = pnand %p1461_p6, %p1455_p3 }
  0x13   :  { %1465 = shalt.err (!%p1462_p7)
}
  0x14   :  { %s1588_s30 = smov 64   ;;  %s1589_s16 = smov 4  }
  0x15   :  { %63 = dma.hbm_to_vmem [thread:$0]  %s1861_s8, 2048, %s58_s19, [#allocation8], %s1588_s30, %s1588_s30, %s1589_s16  }
  0x16   :  { %s1466_s23 = scalar_lea.hbm %s1859_s6, 2048 }
  0x17   :  { %p1467_p8 = scmp.ne.s32.totalorder %s1859_s6, %s1466_s23  ;;  %p1470_p9 = scmp.lt.u32.totalorder %s1466_s23, %s1859_s6 }
  0x19   :  { %p1472_p10 = pnand %p1470_p9, %p1467_p8 }
  0x1b   :  { %1475 = shalt.err (!%p1472_p10)
}
  0x1c   :  { %s1476_s28 = scalar_lea.vmem %s1679_s21, 2048  ;;  %p1481_p12 = scmp.lt.s32.totalorder %s1679_s21, %s1679_s21 }
  0x1d   :  { %p1477_p11 = scmp.ne.s32.totalorder %s1679_s21, %s1476_s28  ;;  %p1482_p13 = scmp.lt.s32.totalorder %s1476_s28, %s1476_s28 }
  0x1f   :  { %p1483_p0 = por %p1482_p13, %p1481_p12 }
  0x21   :  { %p1484_p1 = pnand %p1483_p0, %p1477_p11 }
  0x23   :  { %1487 = shalt.err (!%p1484_p1)
}
  0x24   :  { %49 = dma.hbm_to_vmem [thread:$0]  %s1859_s6, 2048, %s1679_s21, [#allocation5], %s1588_s30, %s1588_s30, %s1589_s16  }
  0x25   :  { %s1590_s29 = smov [#allocation9]   ;;  %s1591_s18 = smov [#allocation10]  }
  0x26   :  { %s71_s17 = sshll.u32 %s1590_s29, 4  ;;  %s85_s20 = sshll.u32 %s1591_s18, 4  ;;  %s72_s17 = int_to_ptr.vmem [resolvable:$true] %s71_s17  ;;  %s1716_s20 = int_to_ptr.vmem [resolvable:$true] %s85_s20 }
  0x27   :  { %s1488_s24 = scalar_lea.hbm %s1863_s10, 2048 }
  0x28   :  { %p1489_p2 = scmp.ne.s32.totalorder %s1863_s10, %s1488_s24  ;;  %p1492_p3 = scmp.lt.u32.totalorder %s1488_s24, %s1863_s10 }
  0x2a   :  { %p1494_p4 = pnand %p1492_p3, %p1489_p2 }
  0x2c   :  { %1497 = shalt.err (!%p1494_p4)
}
  0x2d   :  { %s1498_s6 = scalar_lea.vmem %s72_s17, 2048  ;;  %p1503_p6 = scmp.lt.s32.totalorder %s72_s17, %s72_s17 }
  0x2e   :  { %p1499_p5 = scmp.ne.s32.totalorder %s72_s17, %s1498_s6  ;;  %p1504_p7 = scmp.lt.s32.totalorder %s1498_s6, %s1498_s6 }
  0x30   :  { %p1505_p8 = por %p1504_p7, %p1503_p6 }
  0x32   :  { %p1506_p9 = pnand %p1505_p8, %p1499_p5 }
  0x34   :  { %1509 = shalt.err (!%p1506_p9)
}
  0x35   :  { %77 = dma.hbm_to_vmem [thread:$0]  %s1863_s10, 2048, %s72_s17, [#allocation8], %s1588_s30, %s1588_s30, %s1589_s16  }
  0x36   :  { %s1510_s18 = scalar_lea.hbm %s1865_s12, 2048 }
  0x37   :  { %p1511_p10 = scmp.ne.s32.totalorder %s1865_s12, %s1510_s18  ;;  %p1514_p11 = scmp.lt.u32.totalorder %s1510_s18, %s1865_s12 }
  0x39   :  { %p1516_p12 = pnand %p1514_p11, %p1511_p10 }
  0x3b   :  { %1519 = shalt.err (!%p1516_p12)
}
  0x3c   :  { %s1520_s26 = scalar_lea.vmem %s1716_s20, 2048  ;;  %p1525_p0 = scmp.lt.s32.totalorder %s1716_s20, %s1716_s20 }
  0x3d   :  { %p1521_p13 = scmp.ne.s32.totalorder %s1716_s20, %s1520_s26  ;;  %p1526_p1 = scmp.lt.s32.totalorder %s1520_s26, %s1520_s26 }
  0x3f   :  { %p1527_p2 = por %p1526_p1, %p1525_p0 }
  0x41   :  { %p1528_p3 = pnand %p1527_p2, %p1521_p13 }
  0x43   :  { %1531 = shalt.err (!%p1528_p3)
}
  0x44   :  { %91 = dma.hbm_to_vmem [thread:$0]  %s1865_s12, 2048, %s1716_s20, [#allocation11], %s1588_s30, %s1588_s30, %s1589_s16  }
  0x45   :  { %1576 = dma.done.wait [#allocation5], 2048  }
  0x46   :  { %1577 = vsyncadd [#allocation5], 4294965248 }
  0x47   :  { %1578 = dma.done.wait [#allocation8], 4096  }
  0x48   :  { %1579 = vsyncadd [#allocation8], 4294963200 }
  0x49   :  { %1580 = dma.done.wait [#allocation11], 2048  }
  0x4a   :  { %1581 = vsyncadd [#allocation11], 4294965248  ;;  %v1592_v0 = vmov 0.0   ;;  %vm1593_vm0 = vmmov 0   ;;  %v1594_v1 = vmov 0   ;;  %v1360_v2 = vld [vmem:[%s1857_s4] sm:$0xff]  }
  0x4b   :  { %1321 = vmatprep.subr.bf16.mxu1 %v1592_v0  ;;  %1327 = vmatprep.subr.bf16.mxu0 %v1592_v0  ;;  %v1361_v3 = vld [vmem:[%s1858_s5] sm:$0xff]   ;;  %vm163_vm1 = vcmask 130048   ;;  %v112_v8 = vld [vmem:[%s1855_s2 + $0x8] sm:$0xff]  ;;  %v1372_v18 = vld [vmem:[#allocation4 + $0x50] sm:$0xff]   ;;  %s1596_s26 = smov [#allocation12]  }
  0x4c   :  { %1323 = vmatprep.mubr.msk.bf16.mxu1 %vm1593_vm0, %v1592_v0  ;;  %1329 = vmatprep.mubr.msk.bf16.mxu0 %vm1593_vm0, %v1592_v0  ;;  %v1768_v4 = vld [vmem:[%s1853_s0] sm:$0xff]   ;;  %v114_v9 = vld [vmem:[%s1856_s3 + $0x8] sm:$0xff]  ;;  %v1373_v19 = vld [vmem:[#allocation7 + $0x50] sm:$0xff]   ;;  %s1119_s10 = sshll.u32 %s1596_s26, 4  ;;  %s1120_s10 = int_to_ptr.vmem [resolvable:$true] %s1119_s10 }
  0x4d   :  { %1358 = vset.pattern.permute.xlu0 %v1594_v1  ;;  %1359 = vset.pattern.permute.xlu1 %v1594_v1  ;;  %v1773_v5 = vld [vmem:[%s1854_s1] sm:$0xff]   ;;  %v1368_v14 = vld [vmem:[#allocation4 + $0x48] sm:$0xff]   ;;  %v1374_v20 = vld [vmem:[#allocation4 + $0x10] sm:$0xff]  }
  0x4e   :  { %1322 = vmatpush3.bf16.msra.mxu1 %v1360_v2  ;;  %1328 = vmatpush3.bf16.msra.mxu0 %v1361_v3  ;;  %v111_v6 = vld [vmem:[%s1855_s2] sm:$0xff]  ;;  %v1369_v15 = vld [vmem:[#allocation7 + $0x48] sm:$0xff]   ;;  %v1375_v21 = vld [vmem:[#allocation7 + $0x10] sm:$0xff]  }
  0x4f   :  { %v113_v7 = vld [vmem:[%s1856_s3] sm:$0xff]  ;;  %210 = vperm.xlu0 %1358, %v111_v6   ;;  %v1370_v16 = vld [vmem:[#allocation4 + $0x8] sm:$0xff]   ;;  %v1376_v22 = vld [vmem:[#allocation4 + $0x58] sm:$0xff]  }
  0x50   :  { %470 = vperm.xlu1 %1359, %v113_v7   ;;  %v1364_v10 = vld [vmem:[#allocation4 + $0x40] sm:$0xff]   ;;  %v1371_v17 = vld [vmem:[#allocation7 + $0x8] sm:$0xff]   ;;  %v1377_v23 = vld [vmem:[#allocation7 + $0x58] sm:$0xff]  }
  0x51   :  { %1324 = vmatmul.mubr.msk.bf16.vlgmr.msra.gmra.mrb[0].mxu1 %vm163_vm1, %v1768_v4  ;;  %1330 = vmatmul.mubr.msk.bf16.vlgmr.msra.gmra.mrb[0].mxu0 %vm163_vm1, %v1773_v5  ;;  %v1365_v11 = vld [vmem:[#allocation7 + $0x40] sm:$0xff]   ;;  %v1378_v24 = vld [vmem:[#allocation4 + $0x18] sm:$0xff]   ;;  %v1384_v30 = vld [vmem:[#allocation4 + $0x68] sm:$0xff]  }
  0x52   :  { %361 = vmatprep.mubr.bf16.mxu1 %v1361_v3  ;;  %615 = vmatprep.mubr.bf16.mxu0 %v1360_v2  ;;  %v1366_v12 = vld [vmem:[#allocation4] sm:$0xff]   ;;  %v1379_v25 = vld [vmem:[#allocation7 + $0x18] sm:$0xff]   ;;  %v1385_v31 = vld [vmem:[#allocation7 + $0x68] sm:$0xff]  }
  0x53   :  { %1227 = vmatprep.subr.bf16.mxu1 %v1364_v10  ;;  %215 = vperm.xlu0 %1358, %v112_v8   ;;  %v1367_v13 = vld [vmem:[#allocation7] sm:$0xff]   ;;  %v1386_v32 = vld [vmem:[#allocation4 + $0x28] sm:$0xff]   ;;  %v1388_v34 = vld [vmem:[#allocation4 + $0x70] sm:$0xff]  }
  0x54   :  { %1251 = vmatprep.subr.bf16.mxu0 %v1365_v11  ;;  %475 = vperm.xlu1 %1359, %v114_v9   ;;  %v1380_v26 = vld [vmem:[#allocation4 + $0x60] sm:$0xff]   ;;  %v1387_v33 = vld [vmem:[#allocation7 + $0x28] sm:$0xff]   ;;  %v1389_v35 = vld [vmem:[#allocation7 + $0x70] sm:$0xff]  }
  0x55   :  { %1228 = vmatpush3.bf16.msra.mxu1 %v1366_v12  ;;  %1252 = vmatpush3.bf16.msra.mxu0 %v1367_v13  ;;  %v1381_v27 = vld [vmem:[#allocation7 + $0x60] sm:$0xff]   ;;  %v1390_v36 = vld [vmem:[#allocation4 + $0x30] sm:$0xff]   ;;  %v1392_v38 = vld [vmem:[#allocation4 + $0x78] sm:$0xff]  }
  0x56   :  { %1229 = vmatprep.subr.bf16.mxu1 %v1368_v14  ;;  %1253 = vmatprep.subr.bf16.mxu0 %v1369_v15  ;;  %v1382_v28 = vld [vmem:[#allocation4 + $0x20] sm:$0xff]   ;;  %v1391_v37 = vld [vmem:[#allocation7 + $0x30] sm:$0xff]   ;;  %v1393_v39 = vld [vmem:[#allocation7 + $0x78] sm:$0xff]  }
  0x57   :  { %v1383_v29 = vld [vmem:[#allocation7 + $0x20] sm:$0xff]   ;;  %v1394_v40 = vld [vmem:[#allocation4 + $0x38] sm:$0xff]  }
  0x58   :  { %v1395_v41 = vld [vmem:[#allocation7 + $0x38] sm:$0xff]   ;;  %v1153_v62 = vld [vmem:[%s1860_s7] ss:$0 sm:$0xff] }
  0x59   :  { %1230 = vmatpush3.bf16.msra.mxu1 %v1370_v16  ;;  %1254 = vmatpush3.bf16.msra.mxu0 %v1371_v17  ;;  %v1172_v6 = vld [vmem:[%s1862_s9] ss:$0 sm:$0xff] }
  0x5a   :  { %1231 = vmatprep.subr.bf16.mxu1 %v1372_v18  ;;  %1255 = vmatprep.subr.bf16.mxu0 %v1373_v19 }
  0x5d   :  { %1232 = vmatpush3.bf16.msra.mxu1 %v1374_v20  ;;  %1256 = vmatpush3.bf16.msra.mxu0 %v1375_v21 }
  0x5e   :  { %1233 = vmatprep.subr.bf16.mxu1 %v1376_v22  ;;  %1257 = vmatprep.subr.bf16.mxu0 %v1377_v23 }
  0x61   :  { %1234 = vmatpush3.bf16.msra.mxu1 %v1378_v24  ;;  %1258 = vmatpush3.bf16.msra.mxu0 %v1379_v25 }
  0x62   :  { %1235 = vmatprep.subr.bf16.mxu1 %v1380_v26  ;;  %1259 = vmatprep.subr.bf16.mxu0 %v1381_v27 }
  0x65   :  { %1236 = vmatpush3.bf16.msra.mxu1 %v1382_v28  ;;  %1260 = vmatpush3.bf16.msra.mxu0 %v1383_v29 }
  0x66   :  { %1237 = vmatprep.subr.bf16.mxu1 %v1384_v30  ;;  %1261 = vmatprep.subr.bf16.mxu0 %v1385_v31 }
  0x69   :  { %1238 = vmatpush3.bf16.msra.mxu1 %v1386_v32  ;;  %1262 = vmatpush3.bf16.msra.mxu0 %v1387_v33 }
  0x6a   :  { %1239 = vmatprep.subr.bf16.mxu1 %v1388_v34  ;;  %1263 = vmatprep.subr.bf16.mxu0 %v1389_v35  ;;  %v1396_v35 = vld [vmem:[#allocation10 + $0x40] sm:$0xff]  }
  0x6d   :  { %1240 = vmatpush3.bf16.msra.mxu1 %v1390_v36  ;;  %1264 = vmatpush3.bf16.msra.mxu0 %v1391_v37 }
  0x6e   :  { %1241 = vmatprep.subr.bf16.mxu1 %v1392_v38  ;;  %1265 = vmatprep.subr.bf16.mxu0 %v1393_v39 }
  0x71   :  { %1242 = vmatpush3.bf16.msra.mxu1 %v1394_v40  ;;  %1266 = vmatpush3.bf16.msra.mxu0 %v1395_v41  ;;  %v1397_v40 = vld [vmem:[#allocation10] sm:$0xff]   ;;  %v1398_v41 = vld [vmem:[#allocation10 + $0x48] sm:$0xff]  }
  0x72   :  { %1339 = vmatprep.subr.bf16.mxu0 %v1592_v0  ;;  %1333 = vmatprep.subr.bf16.mxu1 %v1592_v0 }
  0xce   :  { %v1793_v42 = vpop.permute.xlu0 %210 }
  0xcf   :  { %v1795_v43 = vpop.permute.xlu1 %470 }
  0xd2   :  { %v1797_v44 = vpop.permute.xlu0 %215 }
  0xd3   :  { %v1799_v46 = vpop.permute.xlu1 %475 }
 0x124   :  { %v201_v45 = vpop.f32.mrb[0].mxu1  ;;  %v461_v47 = vpop.f32.mrb[0].mxu0 }
 0x125   :  { %v1325_v48 = vpop.f32.mrb[1].mxu1  ;;  %v478_v49 = vmul.f32 %v1795_v43, %v461_v47  ;;  %v1331_v50 = vpop.f32.mrb[1].mxu0  ;;  %v218_v52 = vmul.f32 %v1793_v42, %v201_v45 }
 0x126   :  { %v204_v51 = vpop.f32.mrb[2].mxu1  ;;  %v464_v54 = vpop.f32.mrb[2].mxu0  ;;  %v1400_v48 = vld [vmem:[#allocation9 + $0x40] sm:$0xff]   ;;  %v1399_v50 = vld [vmem:[#allocation10 + $0x8] sm:$0xff]  }
 0x127   :  { %v219_v53 = vmul.f32 %v1797_v44, %v204_v51  ;;  %v1326_v55 = vpop.f32.mrb[3].mxu1  ;;  %v479_v56 = vmul.f32 %v1799_v46, %v464_v54  ;;  %v1332_v57 = vpop.f32.mrb[3].mxu0  ;;  %v1402_v51 = vld [vmem:[#allocation10 + $0x50] sm:$0xff]  }
 0x128   :  { %v1403_v54 = vld [vmem:[#allocation10 + $0x10] sm:$0xff]   ;;  %v1406_v55 = vld [vmem:[#allocation10 + $0x58] sm:$0xff]  }
 0x129   :  { %v220_v58 = vpack.c.bf16 %v219_v53, %v218_v52  ;;  %v480_v59 = vpack.c.bf16 %v479_v56, %v478_v49  ;;  %v1401_v52 = vld [vmem:[#allocation9] sm:$0xff]   ;;  %v1404_v53 = vld [vmem:[#allocation9 + $0x48] sm:$0xff]   ;;  %v1408_v56 = vld [vmem:[#allocation9 + $0x50] sm:$0xff]  }
 0x12a   :  { %v1407_v57 = vld [vmem:[#allocation10 + $0x18] sm:$0xff]  }
 0x12b   :  { %362 = vmatmul.mubr.bf16.vlgmr.msra.gmra.mrb[4].mxu1 %v220_v58  ;;  %616 = vmatmul.mubr.bf16.vlgmr.msra.gmra.mrb[4].mxu0 %v480_v59  ;;  %v1410_v58 = vld [vmem:[#allocation10 + $0x60] sm:$0xff]   ;;  %v1409_v59 = vld [vmem:[#allocation9 + $0x10] sm:$0xff]  }
 0x12c   :  { %1335 = vmatprep.mubr.msk.bf16.mxu1 %vm1593_vm0, %v1592_v0  ;;  %1341 = vmatprep.mubr.msk.bf16.mxu0 %vm1593_vm0, %v1592_v0 }
 0x1fe   :  { %v1243_v60 = vpop.f32.mrb[4].mxu1  ;;  %v1267_v61 = vpop.f32.mrb[4].mxu0 }
 0x1ff   :  { %v1244_v63 = vpop.f32.mrb[5].mxu1  ;;  %v1268_v2 = vpop.f32.mrb[5].mxu0 }
 0x200   :  { %v1245_v1 = vadd.f32 %v1244_v63, %v1243_v60  ;;  %v1246_v3 = vpop.f32.mrb[6].mxu1  ;;  %v1269_v7 = vadd.f32 %v1268_v2, %v1267_v61  ;;  %v1270_v8 = vpop.f32.mrb[6].mxu0  ;;  %v1412_v60 = vld [vmem:[#allocation9 + $0x58] sm:$0xff]   ;;  %v1411_v61 = vld [vmem:[#allocation10 + $0x20] sm:$0xff]   ;;  %v1418_v2 = vld [vmem:[#allocation10 + $0x70] sm:$0xff]  }
 0x201   :  { %v1247_v9 = vpop.f32.mrb[7].mxu1  ;;  %v1271_v0 = vpop.f32.mrb[7].mxu0  ;;  %v1416_v63 = vld [vmem:[#allocation9 + $0x60] sm:$0xff]  }
 0x202   :  { %v364_v10 = vadd.f32 %v1245_v1, %v1153_v62  ;;  %v1248_v11 = vadd.f32 %v1247_v9, %v1246_v3  ;;  %v1272_v12 = vadd.f32 %v1271_v0, %v1270_v8  ;;  %v618_v13 = vadd.f32 %v1269_v7, %v1172_v6  ;;  %v1415_v1 = vld [vmem:[#allocation10 + $0x28] sm:$0xff]   ;;  %v1417_v3 = vld [vmem:[#allocation9 + $0x20] sm:$0xff]   ;;  %v1422_v9 = vld [vmem:[#allocation10 + $0x78] sm:$0xff]  }
 0x203   :  { %v1420_v7 = vld [vmem:[#allocation9 + $0x68] sm:$0xff]   ;;  %v1425_v0 = vld [vmem:[#allocation9 + $0x30] sm:$0xff]  }
 0x204   :  { %v367_v14 = vadd.f32 %v1248_v11, %v1153_v62  ;;  %v370_v15 = vmul.f32 %v364_v10, %v364_v10  ;;  %v621_v17 = vadd.f32 %v1272_v12, %v1172_v6  ;;  %v624_v18 = vmul.f32 %v618_v13, %v618_v13  ;;  %v1414_v62 = vld [vmem:[#allocation10 + $0x68] sm:$0xff]   ;;  %v1419_v6 = vld [vmem:[#allocation10 + $0x30] sm:$0xff]   ;;  %v1426_v12 = vld [vmem:[#allocation9 + $0x78] sm:$0xff]  }
 0x205   :  { %v1421_v8 = vld [vmem:[#allocation9 + $0x28] sm:$0xff]   ;;  %v1424_v11 = vld [vmem:[#allocation9 + $0x70] sm:$0xff]  }
 0x206   :  { %372 = vadd.xlane.f32.xlu0 %v370_v15  ;;  %v371_v16 = vmul.f32 %v367_v14, %v367_v14  ;;  %v625_v19 = vmul.f32 %v621_v17, %v621_v17 }
 0x208   :  { %374 = vadd.xlane.f32.xlu1 %v371_v16 }
 0x20a   :  { %626 = vadd.xlane.f32.xlu0 %v624_v18 }
 0x20e   :  { %628 = vadd.xlane.f32.xlu0 %v625_v19 }
 0x293   :  { %v373_v20 = vpop.xlane.xlu0 %372 }
 0x294   :  { %v376_v21 = vmax.f32 %v373_v20, 1e-24 }
 0x295   :  { %v375_v22 = vpop.xlane.xlu1 %374 }
 0x296   :  { %1428 = vrsqrt.f32 %v376_v21  ;;  %v377_v23 = vmax.f32 %v375_v22, 1e-24 }
 0x297   :  { %v627_v24 = vpop.xlane.xlu0 %626 }
 0x298   :  { %1430 = vrsqrt.f32 %v377_v23  ;;  %v630_v25 = vmax.f32 %v627_v24, 1e-24 }
 0x29a   :  { %1432 = vrsqrt.f32 %v630_v25 }
 0x29b   :  { %v629_v26 = vpop.xlane.xlu0 %628 }
 0x29c   :  { %v631_v27 = vmax.f32 %v629_v26, 1e-24 }
 0x29e   :  { %1434 = vrsqrt.f32 %v631_v27 }
 0x2a0   :  { %v1429_v28 = vpop.eup %1428 }
 0x2a1   :  { %v380_v29 = vmul.f32 %v1429_v28, %v364_v10  ;;  %v1423_v10 = vld [vmem:[#allocation10 + $0x38] sm:$0xff]  }
 0x2a2   :  { %v1431_v30 = vpop.eup %1430 }
 0x2a3   :  { %v381_v31 = vmul.f32 %v1431_v30, %v367_v14  ;;  %v382_v33 = vmax.f32 %v380_v29, 0.0 }
 0x2a4   :  { %v1433_v32 = vpop.eup %1432 }
 0x2a5   :  { %v383_v34 = vmax.f32 %v381_v31, 0.0  ;;  %v634_v37 = vmul.f32 %v1433_v32, %v618_v13  ;;  %v1427_v13 = vld [vmem:[#allocation9 + $0x38] sm:$0xff]  }
 0x2a7   :  { %v384_v36 = vpack.c.bf16 %v383_v34, %v382_v33  ;;  %v636_v45 = vmax.f32 %v634_v37, 0.0  ;;  %v1190_v33 = vld [vmem:[%s1864_s11] ss:$0 sm:$0xff]  ;;  %s1595_s11 = smov [#allocation13]  }
 0x2a8   :  { %v1435_v38 = vpop.eup %1434 }
 0x2a9   :  { %1340 = vmatpush3.bf16.msra.mxu0 %v384_v36  ;;  %v635_v39 = vmul.f32 %v1435_v38, %v621_v17 }
 0x2aa   :  { %1299 = vmatprep.subr.bf16.mxu0 %v1396_v35 }
 0x2ab   :  { %v637_v47 = vmax.f32 %v635_v39, 0.0 }
 0x2ac   :  { %1342 = vmatmul.mubr.msk.bf16.vlgmr.msra.gmra.mrb[8].mxu0 %vm163_vm1, %v1773_v5  ;;  %v1405_v5 = vld [vmem:[#allocation9 + $0x8] sm:$0xff]  }
 0x2ad   :  { %v638_v49 = vpack.c.bf16 %v637_v47, %v636_v45  ;;  %1300 = vmatpush3.bf16.msra.mxu0 %v1397_v40 }
 0x2ae   :  { %1301 = vmatprep.subr.bf16.mxu0 %v1398_v41 }
 0x2af   :  { %1334 = vmatpush3.bf16.msra.mxu1 %v638_v49  ;;  %1089 = vmatprep.mubr.bf16.mxu0 %v638_v49 }
 0x2b0   :  { %1275 = vmatprep.subr.bf16.mxu1 %v1400_v48 }
 0x2b1   :  { %1302 = vmatpush3.bf16.msra.mxu0 %v1399_v50 }
 0x2b2   :  { %1336 = vmatmul.mubr.msk.bf16.vlgmr.msra.gmra.mrb[8].mxu1 %vm163_vm1, %v1768_v4  ;;  %1303 = vmatprep.subr.bf16.mxu0 %v1402_v51  ;;  %v1413_v4 = vld [vmem:[#allocation9 + $0x18] sm:$0xff]  }
 0x2b3   :  { %853 = vmatprep.mubr.bf16.mxu1 %v384_v36  ;;  %1276 = vmatpush3.bf16.msra.mxu1 %v1401_v52 }
 0x2b4   :  { %1277 = vmatprep.subr.bf16.mxu1 %v1404_v53 }
 0x2b5   :  { %1304 = vmatpush3.bf16.msra.mxu0 %v1403_v54 }
 0x2b6   :  { %1305 = vmatprep.subr.bf16.mxu0 %v1406_v55 }
 0x2b7   :  { %1278 = vmatpush3.bf16.msra.mxu1 %v1405_v5 }
 0x2b8   :  { %1279 = vmatprep.subr.bf16.mxu1 %v1408_v56 }
 0x2b9   :  { %1306 = vmatpush3.bf16.msra.mxu0 %v1407_v57 }
 0x2ba   :  { %1307 = vmatprep.subr.bf16.mxu0 %v1410_v58 }
 0x2bb   :  { %1280 = vmatpush3.bf16.msra.mxu1 %v1409_v59 }
 0x2bc   :  { %1281 = vmatprep.subr.bf16.mxu1 %v1412_v60 }
 0x2bd   :  { %1308 = vmatpush3.bf16.msra.mxu0 %v1411_v61 }
 0x2be   :  { %1309 = vmatprep.subr.bf16.mxu0 %v1414_v62 }
 0x2bf   :  { %1282 = vmatpush3.bf16.msra.mxu1 %v1413_v4 }
 0x2c0   :  { %1283 = vmatprep.subr.bf16.mxu1 %v1416_v63 }
 0x2c1   :  { %1310 = vmatpush3.bf16.msra.mxu0 %v1415_v1 }
 0x2c2   :  { %1311 = vmatprep.subr.bf16.mxu0 %v1418_v2 }
 0x2c3   :  { %1284 = vmatpush3.bf16.msra.mxu1 %v1417_v3 }
 0x2c4   :  { %1285 = vmatprep.subr.bf16.mxu1 %v1420_v7 }
 0x2c5   :  { %1312 = vmatpush3.bf16.msra.mxu0 %v1419_v6 }
 0x2c6   :  { %1313 = vmatprep.subr.bf16.mxu0 %v1422_v9 }
 0x2c7   :  { %1286 = vmatpush3.bf16.msra.mxu1 %v1421_v8 }
 0x2c8   :  { %1287 = vmatprep.subr.bf16.mxu1 %v1424_v11 }
 0x2c9   :  { %1314 = vmatpush3.bf16.msra.mxu0 %v1423_v10 }
 0x2cb   :  { %1288 = vmatpush3.bf16.msra.mxu1 %v1425_v0 }
 0x2cc   :  { %1289 = vmatprep.subr.bf16.mxu1 %v1426_v12 }
 0x2cf   :  { %1290 = vmatpush3.bf16.msra.mxu1 %v1427_v13 }
 0x37f   :  { %v945_v14 = vpop.f32.mrb[8].mxu0 }
 0x380   :  { %v1343_v15 = vpop.f32.mrb[9].mxu0  ;;  %v952_v17 = vmul.f32 %v945_v14, %v1795_v43 }
 0x381   :  { %v948_v16 = vpop.f32.mrb[10].mxu0 }
 0x382   :  { %v953_v18 = vmul.f32 %v948_v16, %v1799_v46  ;;  %v1344_v19 = vpop.f32.mrb[11].mxu0 }
 0x384   :  { %v954_v20 = vpack.c.bf16 %v953_v18, %v952_v17 }
 0x385   :  { %v709_v21 = vpop.f32.mrb[8].mxu1 }
 0x386   :  { %v1337_v22 = vpop.f32.mrb[9].mxu1  ;;  %1090 = vmatmul.mubr.bf16.vlgmr.msra.gmra.mrb[12].mxu0 %v954_v20  ;;  %v716_v24 = vmul.f32 %v709_v21, %v1793_v42  ;;  %v1208_v42 = vld [vmem:[%s1866_s13] ss:$0 sm:$0xff]  ;;  %s1131_s13 = sshll.u32 %s1595_s11, 4  ;;  %s1132_s13 = int_to_ptr.vmem [resolvable:$true] %s1131_s13 }
 0x387   :  { %v712_v23 = vpop.f32.mrb[10].mxu1  ;;  %s1532_s17 = scalar_lea.vmem %s1132_s13, 256  ;;  %p1537_p5 = scmp.lt.s32.totalorder %s1132_s13, %s1132_s13 }
 0x388   :  { %v717_v25 = vmul.f32 %v712_v23, %v1797_v44  ;;  %v1338_v26 = vpop.f32.mrb[11].mxu1  ;;  %p1533_p4 = scmp.ne.s32.totalorder %s1132_s13, %s1532_s17  ;;  %p1538_p6 = scmp.lt.s32.totalorder %s1532_s17, %s1532_s17 }
 0x38a   :  { %v718_v27 = vpack.c.bf16 %v717_v25, %v716_v24  ;;  %p1539_p7 = por %p1538_p6, %p1537_p5 }
 0x38c   :  { %854 = vmatmul.mubr.bf16.vlgmr.msra.gmra.mrb[12].mxu1 %v718_v27  ;;  %p1540_p8 = pnand %p1539_p7, %p1533_p4 }
 0x459   :  { %v1315_v28 = vpop.f32.mrb[12].mxu0 }
 0x45a   :  { %v1316_v29 = vpop.f32.mrb[13].mxu0 }
 0x45b   :  { %v1317_v30 = vadd.f32 %v1316_v29, %v1315_v28  ;;  %v1318_v31 = vpop.f32.mrb[14].mxu0 }
 0x45c   :  { %v1319_v43 = vpop.f32.mrb[15].mxu0 }
 0x45d   :  { %v1320_v32 = vadd.f32 %v1319_v43, %v1318_v31  ;;  %v1092_v39 = vadd.f32 %v1317_v30, %v1208_v42 }
 0x45f   :  { %v1291_v46 = vpop.f32.mrb[12].mxu1  ;;  %v1095_v45 = vadd.f32 %v1320_v32, %v1208_v42  ;;  %v1098_v48 = vmul.f32 %v1092_v39, %v1092_v39 }
 0x460   :  { %v1292_v34 = vpop.f32.mrb[13].mxu1 }
 0x461   :  { %v1293_v35 = vadd.f32 %v1292_v34, %v1291_v46  ;;  %v1294_v36 = vpop.f32.mrb[14].mxu1  ;;  %v1099_v49 = vmul.f32 %v1095_v45, %v1095_v45 }
 0x462   :  { %v1295_v44 = vpop.f32.mrb[15].mxu1 }
 0x463   :  { %v856_v37 = vadd.f32 %v1293_v35, %v1190_v33  ;;  %v1296_v38 = vadd.f32 %v1295_v44, %v1294_v36 }
 0x465   :  { %v859_v40 = vadd.f32 %v1296_v38, %v1190_v33  ;;  %v862_v41 = vmul.f32 %v856_v37, %v856_v37 }
 0x467   :  { %864 = vadd.xlane.f32.xlu1 %v862_v41  ;;  %v863_v47 = vmul.f32 %v859_v40, %v859_v40 }
 0x469   :  { %866 = vadd.xlane.f32.xlu0 %v863_v47 }
 0x46b   :  { %1100 = vadd.xlane.f32.xlu1 %v1098_v48 }
 0x46d   :  { %1102 = vadd.xlane.f32.xlu0 %v1099_v49 }
 0x4f4   :  { %v865_v50 = vpop.xlane.xlu1 %864 }
 0x4f5   :  { %v868_v51 = vmax.f32 %v865_v50, 1e-24 }
 0x4f6   :  { %v867_v52 = vpop.xlane.xlu0 %866 }
 0x4f7   :  { %1436 = vrsqrt.f32 %v868_v51  ;;  %v869_v53 = vmax.f32 %v867_v52, 1e-24 }
 0x4f8   :  { %v1101_v54 = vpop.xlane.xlu1 %1100 }
 0x4f9   :  { %1438 = vrsqrt.f32 %v869_v53  ;;  %v1104_v55 = vmax.f32 %v1101_v54, 1e-24 }
 0x4fa   :  { %v1103_v5 = vpop.xlane.xlu0 %1102 }
 0x4fb   :  { %1440 = vrsqrt.f32 %v1104_v55  ;;  %v1105_v56 = vmax.f32 %v1103_v5, 1e-24 }
 0x4fd   :  { %1442 = vrsqrt.f32 %v1105_v56 }
 0x501   :  { %v1437_v57 = vpop.eup %1436 }
 0x502   :  { %v872_v58 = vmul.f32 %v1437_v57, %v856_v37 }
 0x503   :  { %v1439_v59 = vpop.eup %1438 }
 0x504   :  { %v873_v60 = vmul.f32 %v1439_v59, %v859_v40  ;;  %v874_v61 = vmax.f32 %v872_v58, 0.0 }
 0x505   :  { %v1441_v62 = vpop.eup %1440 }
 0x506   :  { %v1108_v4 = vmul.f32 %v1441_v62, %v1092_v39  ;;  %v875_v63 = vmax.f32 %v873_v60, 0.0  ;;  %876 = vst [vmem:[#allocation13] sm:$0xff] %v874_v61 }
 0x507   :  { %v1443_v1 = vpop.eup %1442 }
 0x508   :  { %v1109_v2 = vmul.f32 %v1443_v1, %v1095_v45  ;;  %v1110_v3 = vmax.f32 %v1108_v4, 0.0  ;;  %877 = vst [vmem:[#allocation13 + $0x8] sm:$0xff] %v875_v63 }
 0x509   :  { %1543 = shalt.err (!%p1540_p8)
}
 0x50a   :  { %s1544_s16 = scalar_lea.hbm %s1868_s15, 256 }
 0x50b   :  { %p1545_p9 = scmp.ne.s32.totalorder %s1868_s15, %s1544_s16  ;;  %p1548_p10 = scmp.lt.u32.totalorder %s1544_s16, %s1868_s15 }
 0x50d   :  { %p1550_p11 = pnand %p1548_p10, %p1545_p9 }
 0x50f   :  { %1553 = shalt.err (!%p1550_p11)
}
 0x510   :  { %s1597_s21 = smov 128   ;;  %s1598_s8 = smov 8   ;;  %v1111_v6 = vmax.f32 %v1109_v2, 0.0  ;;  %1112 = vst [vmem:[#allocation12] sm:$0xff] %v1110_v3 }
 0x511   :  { %1137 = dma.vmem_to_hbm [thread:$0]  %s1132_s13, 256, %s1868_s15, [#allocation14], %s1597_s21, %s1597_s21, %s1598_s8  }
 0x512   :  { %1113 = vst [vmem:[#allocation12 + $0x8] sm:$0xff] %v1111_v6  ;;  %s1554_s29 = scalar_lea.vmem %s1120_s10, 256  ;;  %p1559_p13 = scmp.lt.s32.totalorder %s1120_s10, %s1120_s10 }
 0x513   :  { %p1555_p12 = scmp.ne.s32.totalorder %s1120_s10, %s1554_s29  ;;  %p1560_p0 = scmp.lt.s32.totalorder %s1554_s29, %s1554_s29 }
 0x515   :  { %p1561_p1 = por %p1560_p0, %p1559_p13 }
 0x517   :  { %p1562_p2 = pnand %p1561_p1, %p1555_p12 }
 0x519   :  { %1565 = shalt.err (!%p1562_p2)
}
 0x51a   :  { %s1566_s0 = scalar_lea.hbm %s1867_s14, 256 }
 0x51b   :  { %p1567_p3 = scmp.ne.s32.totalorder %s1867_s14, %s1566_s0  ;;  %p1570_p4 = scmp.lt.u32.totalorder %s1566_s0, %s1867_s14 }
 0x51d   :  { %p1572_p5 = pnand %p1570_p4, %p1567_p3 }
 0x51f   :  { %1575 = shalt.err (!%p1572_p5)
}
 0x520   :  { %1125 = dma.vmem_to_hbm [thread:$0]  %s1120_s10, 256, %s1867_s14, [#allocation6], %s1597_s21, %s1597_s21, %s1598_s8  }
 0x521   :  { %1582 = dma.done.wait [#allocation6], 256  }
 0x522   :  { %1583 = vsyncadd [#allocation6], 4294967040 }
 0x523   :  { %1584 = dma.done.wait [#allocation14], 256  }
 0x524   :  { %1585 = vsyncadd [#allocation14], 4294967040 }
 0x525   :  { %1144 = vsyncpa [#allocation5], 1 }
 0x526   :  { %1145 = vsyncpa [#allocation8], 1 }
 0x527   :  { %1146 = vsyncpa [#allocation11], 1 }
 0x528   :  { %1147 = vsyncpa [#allocation6], 1 }
 0x529   :  { %1148 = vsyncpa [#allocation14], 1 }

</bundles_post_ra>
